<compile_context>
chip_gen: v7x
topology: tpu7x:2x2x1
jax: 0.10.0
libtpu: 0.0.40
codegen_flags: <defaults>
</compile_context>

<pallas_src>
import jax
import jax.numpy as jnp
from jax.experimental import pallas as pl
from jax.experimental.pallas import tpu as pltpu


# ----------------------------------------------------------------------------
# Pallas kernel: one grid step == one batch element, everything in VMEM.
# All maps are channels-first: rows = channels/maps, lanes = HW.
# ----------------------------------------------------------------------------
def _minmax_norm_lanes(x):
    # PyTorch normalize_cam1('norm'): per-map min-max over HW (lane axis).
    # Division is pushed to the otherwise-idle EUP via approx reciprocal
    # (rel err ~2e-4, well inside the check tolerance).
    x = x - jnp.min(x, axis=-1, keepdims=True)
    return x * pl.reciprocal(jnp.max(x, axis=-1, keepdims=True) + 1e-12,
                             approx=True)


def agxnet_kernel(coef_ref,               # SMEM (1, 1): annealing * beta
                  x_ref,                  # (1, Cin, HW)  bf16
                  adjt_ref,               # (B, O, A)     bf16  (adj^T, full)
                  wstem_ref,              # (2C, Cin)     bf16  packed stems
                  bstem_ref,              # (2C, 1)       f32
                  wcam_ref,               # (A+O, 2C)     bf16  block-diag [W1;W2]
                  b1_ref,                 # (A, 1)        f32   fc1 bias
                  logits_ref,             # (1, A+O, 128) f32   lane-dense slab
                  cam1n_ref,              # (1, A, HW)    bf16
                  cam1aggn_ref,           # (1, O, HW)    bf16
                  cam2n_ref):             # (1, O, HW)    bf16
    coef = coef_ref[0, 0]
    xb = x_ref[0]                                            # (Cin, HW) bf16
    A = b1_ref.shape[0]
    O = cam2n_ref.shape[1]
    HW = xb.shape[1]
    inv_hw = 1.0 / HW                                        # compile-time const

    # ---- fused synthetic backbones: net1(x)[-1] and net2(x)[-1] ------------
    # TODO(synk): on v5e with Cin this tiny the stem could be a handful of VPU
    #             rank-1 FMAs; with a real backbone Cin is large so keep MXU.
    f12 = jnp.maximum(
        jnp.dot(wstem_ref[...], xb, preferred_element_type=jnp.float32)
        + bstem_ref[...], 0.0)                               # (2C, HW) f32
    f12_bf = f12.astype(jnp.bfloat16)                        # single cast

    # ---- fused cam matmul (block-diagonal weight): one MXU push/drain ------
    #   rows 0:A  -> cam1 = W1 @ f1
    #   rows A:   -> s    = W2 @ f2
    cam_all = jnp.dot(wcam_ref[...], f12_bf,
                      preferred_element_type=jnp.float32)    # (A+O, HW) f32
    cam1 = cam_all[:A]                                       # (A, HW)
    s = cam_all[A:]                                          # (O, HW)

    # average pooling => logit1 = fc1(avgpool(f1)) = mean_HW(cam1) + b1
    logit1_col = jnp.sum(cam1, axis=1, keepdims=True) * inv_hw + b1_ref[...]
    logits_ref[0, :A, :] = jnp.broadcast_to(logit1_col, (A, 128))

    cam1n = _minmax_norm_lanes(cam1)
    cam1n_ref[0] = cam1n.astype(cam1n_ref.dtype)

    # cam1_agg = einsum('bahw,bao->bohw')  ->  (O, HW) = adj^T @ cam1_norm
    adjt = adjt_ref[pl.program_id(0)]                        # (O, A) bf16
    cam1_agg = jnp.dot(adjt, cam1n.astype(jnp.bfloat16),
                       preferred_element_type=jnp.float32)   # (O, HW) f32
    cam1aggn = _minmax_norm_lanes(cam1_agg)
    cam1aggn_ref[0] = cam1aggn.astype(cam1aggn_ref.dtype)

    # cam2 = einsum('bochw,oc->bohw') with f2_mod = f2*(1 + coef*cam1_agg_norm)
    # collapses to (1 + coef*cam1_agg_norm) * (W2 @ f2) = (1+coef*cam1aggn)*s.
    cam2 = (1.0 + coef * cam1aggn) * s                       # (O, HW) f32
    cam2n_ref[0] = _minmax_norm_lanes(cam2).astype(cam2n_ref.dtype)
    # average pooling => logit2 = einsum('boc,oc->bo', avgpool(f2_mod), W2)
    #                           = mean_HW(cam2)
    logit2_col = jnp.sum(cam2, axis=1, keepdims=True) * inv_hw
    logits_ref[0, A:, :] = jnp.broadcast_to(logit2_col, (O, 128))


# ----------------------------------------------------------------------------
# JAX wrapper (layout glue + pallas_call)
# ----------------------------------------------------------------------------
def agxnet_forward(x, adj_mtx, annealing, params, *, beta):
    """x: (B, Cin, H, W) NCHW float32 (PyTorch convention)."""
    B, Cin, H, W = x.shape
    HW = H * W
    bf = lambda t: t.astype(jnp.bfloat16)

    # NCHW -> (B, Cin, HW) is a pure reshape (no transpose, no HBM shuffle).
    x_flat = bf(x.reshape(B, Cin, HW))
    adj_t = bf(jnp.swapaxes(adj_mtx, 1, 2))                   # (B, O, A), tiny
    ws = bf(jnp.concatenate([params["ws1"], params["ws2"]], axis=0))  # (2C,Cin)
    bs = jnp.concatenate([params["bs1"], params["bs2"]],
                         axis=0).reshape(-1, 1).astype(jnp.float32)   # (2C,1)
    w1 = params["w1"]                                         # (A, C)
    w2 = params["w2"]                                         # (O, C)
    b1 = params["b1"].reshape(-1, 1).astype(jnp.float32)      # (A, 1)

    C = params["ws1"].shape[0]
    A = w1.shape[0]
    O = w2.shape[0]

    # Block-diagonal fused cam weight: [[W1, 0], [0, W2]]  -> (A+O, 2C)
    wcam = jnp.zeros((A + O, 2 * C), jnp.float32)
    wcam = wcam.at[:A, :C].set(w1).at[A:, C:].set(w2)
    wcam = bf(wcam)

    coef = jnp.array([[annealing * beta]], jnp.float32)

    full2 = lambda shape: pl.BlockSpec(shape, lambda b: (0, 0))
    in_specs = [
        pl.BlockSpec(memory_space=pltpu.MemorySpace.SMEM),    # coef scalar
        pl.BlockSpec((1, Cin, HW), lambda b: (b, 0, 0)),      # x (channels-first)
        pl.BlockSpec((B, O, A), lambda b: (0, 0, 0)),         # adj^T, block-revisited
        full2((2 * C, Cin)), full2((2 * C, 1)),               # packed stems
        full2((A + O, 2 * C)),                                # fused cam weight
        full2((A, 1)),                                        # fc1 bias
    ]
    out_shapes = (
        jax.ShapeDtypeStruct((B, A + O, 128), jnp.float32),   # logits slab
        jax.ShapeDtypeStruct((B, A, HW), jnp.bfloat16),       # cam1_norm
        jax.ShapeDtypeStruct((B, O, HW), jnp.bfloat16),       # cam1_agg_norm
        jax.ShapeDtypeStruct((B, O, HW), jnp.bfloat16),       # cam2_norm
    )
    out_specs = (
        pl.BlockSpec((1, A + O, 128), lambda b: (b, 0, 0)),
        pl.BlockSpec((1, A, HW), lambda b: (b, 0, 0)),
        pl.BlockSpec((1, O, HW), lambda b: (b, 0, 0)),
        pl.BlockSpec((1, O, HW), lambda b: (b, 0, 0)),
    )

    # Advisory cost estimate so XLA can schedule neighbors around the call.
    flops = (2 * B * HW * (2 * C * Cin + (A + O) * 2 * C + O * A)
             + 10 * B * HW * (A + 2 * O))
    bytes_in = (x_flat.size * 2 + adj_t.size * 2 + ws.size * 2 + bs.size * 4
                + wcam.size * 2 + b1.size * 4 + 4)
    bytes_out = (B * (A + O) * 128 * 4 + B * A * HW * 2 + 2 * B * O * HW * 2)
    ce = pl.CostEstimate(flops=flops, transcendentals=B * (A + 2 * O),
                         bytes_accessed=bytes_in + bytes_out)

    logits, cam1n, cam1aggn, cam2n = pl.pallas_call(
        agxnet_kernel,
        out_shape=out_shapes,
        grid=(B,),
        in_specs=in_specs,
        out_specs=out_specs,
        compiler_params=pltpu.CompilerParams(
            dimension_semantics=("parallel",)),               # megacore on v7x
        cost_estimate=ce,
    )(coef, x_flat, adj_t, ws, bs, wcam, b1)

    logit_all = logits[:, :, 0]                               # (B, A+O)
    # CAMs are channel-major over HW -> pure reshapes back to NCHW.
    return (logit_all[:, :A],
            logit_all[:, A:],
            cam1n.reshape(B, A, H, W),
            cam1aggn.reshape(B, O, H, W),
            cam2n.reshape(B, O, H, W))


# ----------------------------------------------------------------------------
# Pure-JAX reference (mirrors the PyTorch einsum graph; same bf16 operand
# casts + f32 accumulation as the kernel, but exact divisions / f32 CAMs).
# ----------------------------------------------------------------------------
def agxnet_reference(x, adj_mtx, annealing, params, *, beta):
    B, Cin, H, W = x.shape
    HW = H * W
    bf = lambda t: t.astype(jnp.bfloat16)
    f32 = jnp.float32

    xc = bf(x.reshape(B, Cin, HW))                            # (B, Cin, HW)
    ws1, bs1 = params["ws1"], params["bs1"]
    ws2, bs2 = params["ws2"], params["bs2"]
    w1, b1 = params["w1"], params["b1"]
    w2 = params["w2"]
    A, O = w1.shape[0], w2.shape[0]

    def norm(c):  # min-max over HW (last axis)
        c = c - c.min(axis=-1, keepdims=True)
        return c / (c.max(axis=-1, keepdims=True) + 1e-12)

    relu = lambda v: jnp.maximum(v, 0.0)
    f1 = relu(jnp.einsum('ci,bih->bch', bf(ws1), xc,
                         preferred_element_type=f32) + bs1[None, :, None])
    f2 = relu(jnp.einsum('ci,bih->bch', bf(ws2), xc,
                         preferred_element_type=f32) + bs2[None, :, None])

    cam1 = jnp.einsum('ac,bch->bah', bf(w1), bf(f1),
                      preferred_element_type=f32)             # (B, A, HW)
    logit1 = cam1.mean(axis=-1) + b1[None, :]                 # == fc1(avgpool(f1))
    cam1n = norm(cam1)

    cam1_agg = jnp.einsum('bao,bah->boh', bf(adj_mtx), bf(cam1n),
                          preferred_element_type=f32)         # (B, O, HW)
    cam1aggn = norm(cam1_agg)

    mod = 1.0 + annealing * beta * cam1aggn                   # (B, O, HW)
    s = jnp.einsum('oc,bch->boh', bf(w2), bf(f2),
                   preferred_element_type=f32)                # (B, O, HW)
    cam2 = mod * s                      # == einsum('bochw,oc->bohw', f2*mod, W2)
    cam2n = norm(cam2)
    logit2 = cam2.mean(axis=-1)         # == einsum('boc,oc->bo', avgpool, W2)

    return (logit1, logit2,
            cam1n.reshape(B, A, H, W),
            cam1aggn.reshape(B, O, H, W),
            cam2n.reshape(B, O, H, W))


# ----------------------------------------------------------------------------
if __name__ == "__main__":
    B, Cin, H, W = 2, 4, 16, 16
    C, A, O = 32, 8, 6          # hidden channels, N_landmarks_spec, N_selected_obs
    beta, annealing = 0.5, 0.7

    key = jax.random.PRNGKey(0)
    ks = jax.random.split(key, 9)
    params = {
        "ws1": jax.random.normal(ks[0], (C, Cin), jnp.float32) * 0.2,
        "bs1": jax.random.normal(ks[1], (C,), jnp.float32) * 0.1,
        "ws2": jax.random.normal(ks[2], (C, Cin), jnp.float32) * 0.2,
        "bs2": jax.random.normal(ks[3], (C,), jnp.float32) * 0.1,
        "w1": jax.random.normal(ks[4], (A, C), jnp.float32) * 0.2,
        "b1": jax.random.normal(ks[5], (A,), jnp.float32) * 0.1,
        "w2": jax.random.normal(ks[6], (O, C), jnp.float32) * 0.2,
    }
    x = jax.random.normal(ks[7], (B, Cin, H, W), jnp.float32)
    adj_mtx = jax.random.uniform(ks[8], (B, A, O), jnp.float32)

    outs = agxnet_forward(x, adj_mtx, annealing, params, beta=beta)
    outs = jax.block_until_ready(outs)

    refs = agxnet_reference(x, adj_mtx, annealing, params, beta=beta)
    names = ["logit1", "logit2", "cam1_norm", "cam1_agg_norm", "cam2_norm"]
    # CAMs are emitted in bf16 with approx-reciprocal normalization -> looser tol.
    tols = {"logit1": 5e-3, "logit2": 5e-3,
            "cam1_norm": 1e-2, "cam1_agg_norm": 1e-2, "cam2_norm": 1e-2}
    for name, o, r in zip(names, outs, refs):
        assert o.shape == r.shape, (name, o.shape, r.shape)
        o32 = o.astype(jnp.float32)
        err = float(jnp.max(jnp.abs(o32 - r)))
        assert jnp.allclose(o32, r, rtol=tols[name], atol=tols[name]), (name, err)

    print("KERNEL_OK")
</pallas_src>

<mosaic_0001>
module attributes {stable_mosaic.version = 11 : i64} {
  func.func @agxnet_kernel(%arg0: i32, %arg1: memref<1x1xf32, #tpu.memory_space<smem>>, %arg2: memref<1x4x256xbf16, #tpu.memory_space<vmem>>, %arg3: memref<2x6x8xbf16, #tpu.memory_space<vmem>>, %arg4: memref<64x4xbf16, #tpu.memory_space<vmem>>, %arg5: memref<64x1xf32, #tpu.memory_space<vmem>>, %arg6: memref<14x64xbf16, #tpu.memory_space<vmem>>, %arg7: memref<8x1xf32, #tpu.memory_space<vmem>>, %arg8: memref<1x14x128xf32, #tpu.memory_space<vmem>>, %arg9: memref<1x8x256xbf16, #tpu.memory_space<vmem>>, %arg10: memref<1x6x256xbf16, #tpu.memory_space<vmem>>, %arg11: memref<1x6x256xbf16, #tpu.memory_space<vmem>>) attributes {dimension_semantics = [#tpu.dimension_semantics<parallel>], iteration_bounds = array<i64: 2>, scalar_prefetch = 0 : i64, scratch_operands = 0 : i64, tpu.core_type = #tpu.core_type<tc>, window_params = [{transform_indices = @transform_0, window_bounds = array<i64: 1, 1>}, {transform_indices = @transform_1, window_bounds = array<i64: 1, 4, 256>}, {pipeline_mode = #tpu.pipeline_mode<synchronous>, transform_indices = @transform_2, window_bounds = array<i64: 2, 6, 8>}, {pipeline_mode = #tpu.pipeline_mode<synchronous>, transform_indices = @transform_3, window_bounds = array<i64: 64, 4>}, {pipeline_mode = #tpu.pipeline_mode<synchronous>, transform_indices = @transform_4, window_bounds = array<i64: 64, 1>}, {pipeline_mode = #tpu.pipeline_mode<synchronous>, transform_indices = @transform_5, window_bounds = array<i64: 14, 64>}, {pipeline_mode = #tpu.pipeline_mode<synchronous>, transform_indices = @transform_6, window_bounds = array<i64: 8, 1>}, {transform_indices = @transform_7, window_bounds = array<i64: 1, 14, 128>}, {transform_indices = @transform_8, window_bounds = array<i64: 1, 8, 256>}, {transform_indices = @transform_9, window_bounds = array<i64: 1, 6, 256>}, {transform_indices = @transform_10, window_bounds = array<i64: 1, 6, 256>}]} {
    %c0 = arith.constant 0 : index
    %c0_0 = arith.constant 0 : index
    %0 = memref.load %arg1[%c0, %c0_0] : memref<1x1xf32, #tpu.memory_space<smem>>
    %c0_1 = arith.constant 0 : index
    %c0_2 = arith.constant 0 : index
    %c0_3 = arith.constant 0 : index
    %1 = vector.load %arg2[%c0_1, %c0_2, %c0_3] : memref<1x4x256xbf16, #tpu.memory_space<vmem>>, vector<1x4x256xbf16>
    %2 = vector.shape_cast %1 : vector<1x4x256xbf16> to vector<4x256xbf16>
    %c0_4 = arith.constant 0 : index
    %c0_5 = arith.constant 0 : index
    %3 = vector.load %arg4[%c0_4, %c0_5] : memref<64x4xbf16, #tpu.memory_space<vmem>>, vector<64x4xbf16>
    %cst = arith.constant dense<0.000000e+00> : vector<64x256xf32>
    %4 = tpu.matmul %3, %2, %cst {dimension_numbers = #tpu.dot_dimension_numbers<[1], [0], [0], [1], [0, 0, 1, 1], [], []>} : vector<64x4xbf16>, vector<4x256xbf16>, vector<64x256xf32> -> vector<64x256xf32>
    %c0_6 = arith.constant 0 : index
    %c0_7 = arith.constant 0 : index
    %5 = vector.load %arg5[%c0_6, %c0_7] : memref<64x1xf32, #tpu.memory_space<vmem>>, vector<64x1xf32>
    %6 = vector.broadcast %5 : vector<64x1xf32> to vector<64x256xf32>
    %7 = arith.addf %4, %6 : vector<64x256xf32>
    %cst_8 = arith.constant 0.000000e+00 : f32
    %8 = vector.broadcast %cst_8 : f32 to vector<64x256xf32>
    %9 = arith.maximumf %7, %8 : vector<64x256xf32>
    %10 = arith.truncf %9 : vector<64x256xf32> to vector<64x256xbf16>
    %c0_9 = arith.constant 0 : index
    %c0_10 = arith.constant 0 : index
    %11 = vector.load %arg6[%c0_9, %c0_10] : memref<14x64xbf16, #tpu.memory_space<vmem>>, vector<14x64xbf16>
    %cst_11 = arith.constant dense<0.000000e+00> : vector<14x256xf32>
    %12 = tpu.matmul %11, %10, %cst_11 {dimension_numbers = #tpu.dot_dimension_numbers<[1], [0], [0], [1], [0, 0, 1, 1], [], []>} : vector<14x64xbf16>, vector<64x256xbf16>, vector<14x256xf32> -> vector<14x256xf32>
    %13 = vector.extract_strided_slice %12 {offsets = [0, 0], sizes = [8, 256], strides = [1, 1]} : vector<14x256xf32> to vector<8x256xf32>
    %14 = vector.extract_strided_slice %12 {offsets = [8, 0], sizes = [6, 256], strides = [1, 1]} : vector<14x256xf32> to vector<6x256xf32>
    %cst_12 = arith.constant dense<0.000000e+00> : vector<8xf32>
    %15 = vector.multi_reduction <add>, %13, %cst_12 [1] : vector<8x256xf32> to vector<8xf32>
    %16 = vector.shape_cast %15 : vector<8xf32> to vector<8x1xf32>
    %cst_13 = arith.constant 3.906250e-03 : f32
    %17 = vector.broadcast %cst_13 : f32 to vector<8x1xf32>
    %18 = arith.mulf %16, %17 : vector<8x1xf32>
    %c0_14 = arith.constant 0 : index
    %c0_15 = arith.constant 0 : index
    %19 = vector.load %arg7[%c0_14, %c0_15] : memref<8x1xf32, #tpu.memory_space<vmem>>, vector<8x1xf32>
    %20 = arith.addf %18, %19 : vector<8x1xf32>
    %21 = vector.shape_cast %20 : vector<8x1xf32> to vector<8x1xf32>
    %22 = vector.broadcast %21 : vector<8x1xf32> to vector<8x128xf32>
    %c0_16 = arith.constant 0 : index
    %c0_17 = arith.constant 0 : index
    %c0_18 = arith.constant 0 : index
    %23 = vector.load %arg8[%c0_16, %c0_17, %c0_18] : memref<1x14x128xf32, #tpu.memory_space<vmem>>, vector<1x8x128xf32>
    %24 = vector.shape_cast %23 : vector<1x8x128xf32> to vector<8x128xf32>
    %25 = vector.shape_cast %22 : vector<8x128xf32> to vector<1x8x128xf32>
    tpu.vector_store %arg8[%c0_16, %c0_17, %c0_18], %25 {strides = array<i32>} : memref<1x14x128xf32, #tpu.memory_space<vmem>>, vector<1x8x128xf32>,
    %cst_19 = arith.constant dense<0x7F800000> : vector<8xf32>
    %26 = vector.multi_reduction <minimumf>, %13, %cst_19 [1] : vector<8x256xf32> to vector<8xf32>
    %27 = vector.shape_cast %26 : vector<8xf32> to vector<8x1xf32>
    %28 = vector.broadcast %27 : vector<8x1xf32> to vector<8x256xf32>
    %29 = arith.subf %13, %28 : vector<8x256xf32>
    %cst_20 = arith.constant dense<0xFF800000> : vector<8xf32>
    %30 = vector.multi_reduction <maximumf>, %29, %cst_20 [1] : vector<8x256xf32> to vector<8xf32>
    %31 = vector.shape_cast %30 : vector<8xf32> to vector<8x1xf32>
    %cst_21 = arith.constant 9.99999996E-13 : f32
    %32 = vector.broadcast %cst_21 : f32 to vector<8x1xf32>
    %33 = arith.addf %31, %32 : vector<8x1xf32>
    %34 = tpu.reciprocal %33 {approx = true} : vector<8x1xf32> -> vector<8x1xf32>
    %35 = vector.broadcast %34 : vector<8x1xf32> to vector<8x256xf32>
    %36 = arith.mulf %29, %35 : vector<8x256xf32>
    %37 = arith.truncf %36 : vector<8x256xf32> to vector<8x256xbf16>
    %c0_22 = arith.constant 0 : index
    %c0_23 = arith.constant 0 : index
    %c0_24 = arith.constant 0 : index
    %38 = vector.load %arg9[%c0_22, %c0_23, %c0_24] : memref<1x8x256xbf16, #tpu.memory_space<vmem>>, vector<1x8x256xbf16>
    %39 = vector.shape_cast %38 : vector<1x8x256xbf16> to vector<8x256xbf16>
    %40 = vector.shape_cast %37 : vector<8x256xbf16> to vector<1x8x256xbf16>
    tpu.vector_store %arg9[%c0_22, %c0_23, %c0_24], %40 {strides = array<i32>} : memref<1x8x256xbf16, #tpu.memory_space<vmem>>, vector<1x8x256xbf16>,
    %41 = arith.index_cast %arg0 : i32 to index
    %c0_25 = arith.constant 0 : index
    %c0_26 = arith.constant 0 : index
    %42 = vector.load %arg3[%41, %c0_25, %c0_26] : memref<2x6x8xbf16, #tpu.memory_space<vmem>>, vector<1x6x8xbf16>
    %43 = vector.shape_cast %42 : vector<1x6x8xbf16> to vector<6x8xbf16>
    %44 = arith.truncf %36 : vector<8x256xf32> to vector<8x256xbf16>
    %cst_27 = arith.constant dense<0.000000e+00> : vector<6x256xf32>
    %45 = tpu.matmul %43, %44, %cst_27 {dimension_numbers = #tpu.dot_dimension_numbers<[1], [0], [0], [1], [0, 0, 1, 1], [], []>} : vector<6x8xbf16>, vector<8x256xbf16>, vector<6x256xf32> -> vector<6x256xf32>
    %cst_28 = arith.constant dense<0x7F800000> : vector<6xf32>
    %46 = vector.multi_reduction <minimumf>, %45, %cst_28 [1] : vector<6x256xf32> to vector<6xf32>
    %47 = vector.shape_cast %46 : vector<6xf32> to vector<6x1xf32>
    %48 = vector.broadcast %47 : vector<6x1xf32> to vector<6x256xf32>
    %49 = arith.subf %45, %48 : vector<6x256xf32>
    %cst_29 = arith.constant dense<0xFF800000> : vector<6xf32>
    %50 = vector.multi_reduction <maximumf>, %49, %cst_29 [1] : vector<6x256xf32> to vector<6xf32>
    %51 = vector.shape_cast %50 : vector<6xf32> to vector<6x1xf32>
    %cst_30 = arith.constant 9.99999996E-13 : f32
    %52 = vector.broadcast %cst_30 : f32 to vector<6x1xf32>
    %53 = arith.addf %51, %52 : vector<6x1xf32>
    %54 = tpu.reciprocal %53 {approx = true} : vector<6x1xf32> -> vector<6x1xf32>
    %55 = vector.broadcast %54 : vector<6x1xf32> to vector<6x256xf32>
    %56 = arith.mulf %49, %55 : vector<6x256xf32>
    %57 = arith.truncf %56 : vector<6x256xf32> to vector<6x256xbf16>
    %c0_31 = arith.constant 0 : index
    %c0_32 = arith.constant 0 : index
    %c0_33 = arith.constant 0 : index
    %58 = vector.load %arg10[%c0_31, %c0_32, %c0_33] : memref<1x6x256xbf16, #tpu.memory_space<vmem>>, vector<1x6x256xbf16>
    %59 = vector.shape_cast %58 : vector<1x6x256xbf16> to vector<6x256xbf16>
    %60 = vector.shape_cast %57 : vector<6x256xbf16> to vector<1x6x256xbf16>
    tpu.vector_store %arg10[%c0_31, %c0_32, %c0_33], %60 {strides = array<i32>} : memref<1x6x256xbf16, #tpu.memory_space<vmem>>, vector<1x6x256xbf16>,
    %61 = vector.broadcast %0 : f32 to vector<6x256xf32>
    %62 = arith.mulf %61, %56 : vector<6x256xf32>
    %cst_34 = arith.constant 1.000000e+00 : f32
    %63 = vector.broadcast %cst_34 : f32 to vector<6x256xf32>
    %64 = arith.addf %63, %62 : vector<6x256xf32>
    %65 = arith.mulf %64, %14 : vector<6x256xf32>
    %cst_35 = arith.constant dense<0x7F800000> : vector<6xf32>
    %66 = vector.multi_reduction <minimumf>, %65, %cst_35 [1] : vector<6x256xf32> to vector<6xf32>
    %67 = vector.shape_cast %66 : vector<6xf32> to vector<6x1xf32>
    %68 = vector.broadcast %67 : vector<6x1xf32> to vector<6x256xf32>
    %69 = arith.subf %65, %68 : vector<6x256xf32>
    %cst_36 = arith.constant dense<0xFF800000> : vector<6xf32>
    %70 = vector.multi_reduction <maximumf>, %69, %cst_36 [1] : vector<6x256xf32> to vector<6xf32>
    %71 = vector.shape_cast %70 : vector<6xf32> to vector<6x1xf32>
    %cst_37 = arith.constant 9.99999996E-13 : f32
    %72 = vector.broadcast %cst_37 : f32 to vector<6x1xf32>
    %73 = arith.addf %71, %72 : vector<6x1xf32>
    %74 = tpu.reciprocal %73 {approx = true} : vector<6x1xf32> -> vector<6x1xf32>
    %75 = vector.broadcast %74 : vector<6x1xf32> to vector<6x256xf32>
    %76 = arith.mulf %69, %75 : vector<6x256xf32>
    %77 = arith.truncf %76 : vector<6x256xf32> to vector<6x256xbf16>
    %c0_38 = arith.constant 0 : index
    %c0_39 = arith.constant 0 : index
    %c0_40 = arith.constant 0 : index
    %78 = vector.load %arg11[%c0_38, %c0_39, %c0_40] : memref<1x6x256xbf16, #tpu.memory_space<vmem>>, vector<1x6x256xbf16>
    %79 = vector.shape_cast %78 : vector<1x6x256xbf16> to vector<6x256xbf16>
    %80 = vector.shape_cast %77 : vector<6x256xbf16> to vector<1x6x256xbf16>
    tpu.vector_store %arg11[%c0_38, %c0_39, %c0_40], %80 {strides = array<i32>} : memref<1x6x256xbf16, #tpu.memory_space<vmem>>, vector<1x6x256xbf16>,
    %cst_41 = arith.constant dense<0.000000e+00> : vector<6xf32>
    %81 = vector.multi_reduction <add>, %65, %cst_41 [1] : vector<6x256xf32> to vector<6xf32>
    %82 = vector.shape_cast %81 : vector<6xf32> to vector<6x1xf32>
    %cst_42 = arith.constant 3.906250e-03 : f32
    %83 = vector.broadcast %cst_42 : f32 to vector<6x1xf32>
    %84 = arith.mulf %82, %83 : vector<6x1xf32>
    %85 = vector.shape_cast %84 : vector<6x1xf32> to vector<6x1xf32>
    %86 = vector.broadcast %85 : vector<6x1xf32> to vector<6x128xf32>
    %c0_43 = arith.constant 0 : index
    %c8 = arith.constant 8 : index
    %c0_44 = arith.constant 0 : index
    %87 = vector.load %arg8[%c0_43, %c8, %c0_44] : memref<1x14x128xf32, #tpu.memory_space<vmem>>, vector<1x6x128xf32>
    %88 = vector.shape_cast %87 : vector<1x6x128xf32> to vector<6x128xf32>
    %89 = vector.shape_cast %86 : vector<6x128xf32> to vector<1x6x128xf32>
    tpu.vector_store %arg8[%c0_43, %c8, %c0_44], %89 {strides = array<i32>} : memref<1x14x128xf32, #tpu.memory_space<vmem>>, vector<1x6x128xf32>,
    return
  }
  func.func @transform_0(%arg0: i32) -> (i32, i32) {
    %c0_i32 = arith.constant 0 : i32
    %c0_i32_0 = arith.constant 0 : i32
    %c0_i32_1 = arith.constant 0 : i32
    return %c0_i32, %c0_i32_0 : i32, i32
  }
  func.func @transform_1(%arg0: i32) -> (i32, i32, i32) {
    %c0_i32 = arith.constant 0 : i32
    %c0_i32_0 = arith.constant 0 : i32
    %c0_i32_1 = arith.constant 0 : i32
    return %arg0, %c0_i32, %c0_i32_0 : i32, i32, i32
  }
  func.func @transform_2(%arg0: i32) -> (i32, i32, i32) {
    %c0_i32 = arith.constant 0 : i32
    %c0_i32_0 = arith.constant 0 : i32
    %c0_i32_1 = arith.constant 0 : i32
    %c0_i32_2 = arith.constant 0 : i32
    return %c0_i32, %c0_i32_0, %c0_i32_1 : i32, i32, i32
  }
  func.func @transform_3(%arg0: i32) -> (i32, i32) {
    %c0_i32 = arith.constant 0 : i32
    %c0_i32_0 = arith.constant 0 : i32
    %c0_i32_1 = arith.constant 0 : i32
    return %c0_i32, %c0_i32_0 : i32, i32
  }
  func.func @transform_4(%arg0: i32) -> (i32, i32) {
    %c0_i32 = arith.constant 0 : i32
    %c0_i32_0 = arith.constant 0 : i32
    %c0_i32_1 = arith.constant 0 : i32
    return %c0_i32, %c0_i32_0 : i32, i32
  }
  func.func @transform_5(%arg0: i32) -> (i32, i32) {
    %c0_i32 = arith.constant 0 : i32
    %c0_i32_0 = arith.constant 0 : i32
    %c0_i32_1 = arith.constant 0 : i32
    return %c0_i32, %c0_i32_0 : i32, i32
  }
  func.func @transform_6(%arg0: i32) -> (i32, i32) {
    %c0_i32 = arith.constant 0 : i32
    %c0_i32_0 = arith.constant 0 : i32
    %c0_i32_1 = arith.constant 0 : i32
    return %c0_i32, %c0_i32_0 : i32, i32
  }
  func.func @transform_7(%arg0: i32) -> (i32, i32, i32) {
    %c0_i32 = arith.constant 0 : i32
    %c0_i32_0 = arith.constant 0 : i32
    %c0_i32_1 = arith.constant 0 : i32
    return %arg0, %c0_i32, %c0_i32_0 : i32, i32, i32
  }
  func.func @transform_8(%arg0: i32) -> (i32, i32, i32) {
    %c0_i32 = arith.constant 0 : i32
    %c0_i32_0 = arith.constant 0 : i32
    %c0_i32_1 = arith.constant 0 : i32
    return %arg0, %c0_i32, %c0_i32_0 : i32, i32, i32
  }
  func.func @transform_9(%arg0: i32) -> (i32, i32, i32) {
    %c0_i32 = arith.constant 0 : i32
    %c0_i32_0 = arith.constant 0 : i32
    %c0_i32_1 = arith.constant 0 : i32
    return %arg0, %c0_i32, %c0_i32_0 : i32, i32, i32
  }
  func.func @transform_10(%arg0: i32) -> (i32, i32, i32) {
    %c0_i32 = arith.constant 0 : i32
    %c0_i32_0 = arith.constant 0 : i32
    %c0_i32_1 = arith.constant 0 : i32
    return %arg0, %c0_i32, %c0_i32_0 : i32, i32, i32
  }
}

</mosaic_0001>

<bundles_post_ra>
// kernel: tpu_custom_call.1
= control target key start
LH: loop header
LB: loop body
LE: loop exit
PB: predicated region body
PF: predicated region fallthrough
CT: control target
= control target key end

     0   :  { %s1405_s0 = inlined_call_operand.<no memory space> [shape: f32[1,1], index: 0, kind: input, shape index: {}]   ;;  %s1406_s1 = inlined_call_operand.vmem [shape: bf16[2,4,256], index: 1, kind: input, shape index: {}]   ;;  %s1407_s2 = inlined_call_operand.vmem [shape: bf16[2,6,8], index: 2, kind: input, shape index: {}]   ;;  %s1408_s3 = inlined_call_operand.vmem [shape: bf16[64,4], index: 3, kind: input, shape index: {}]   ;;  %s1409_s4 = inlined_call_operand.vmem [shape: f32[64,1], index: 4, kind: input, shape index: {}]   ;;  %s1410_s5 = inlined_call_operand.vmem [shape: bf16[14,64], index: 5, kind: input, shape index: {}]   ;;  %s1411_s6 = inlined_call_operand.vmem [shape: f32[8,1], index: 6, kind: input, shape index: {}]   ;;  %s1412_s7 = inlined_call_operand.vmem [shape: f32[2,14,128], index: 7, kind: output, shape index: {0}]   ;;  %s1413_s8 = inlined_call_operand.hbm [shape: bf16[2,8,256], index: 8, kind: output, shape index: {1}]   ;;  %s1414_s9 = inlined_call_operand.vmem [shape: bf16[2,6,256], index: 9, kind: output, shape index: {2}]   ;;  %s1415_s10 = inlined_call_operand.vmem [shape: bf16[2,6,256], index: 10, kind: output, shape index: {3}]  }
   0x1   :  { %1417 = sst [smem:[#allocation6_spill]] %s1406_s1 }
   0x2   :  { %1418 = sst [smem:[#allocation7_spill]] %s1407_s2 }
   0x3   :  { %1419 = sst [smem:[#allocation8_spill]] %s1408_s3 }
   0x4   :  { %16 = sst [smem:[#allocation2]] %s1405_s0 }
   0x5   :  { %17 = vsyncpa [#allocation4], 0 }
   0x6   :  { %19 = vsyncpa [#allocation4 + $0x1], 0  ;;  %s1204_s15 = smov 0   ;;  %s1206_s16 = smov 0  }
   0x7   :  { %s1208_s17 = smov 0   ;;  %s1210_s18 = smov 0  }
   0x8 LB: > { %s1225_s0 = sadd.s32 4294967295, %s1142_s18   ;;  %s983_s19 = sadd.s32 4294967294, %s1142_s18   ;;  %s1142_s18 = sphi %s1210_s18, %s1429_s18   ;;  %s1138_s17 = sphi %s1208_s17, %s1428_s17   ;;  %s1134_s16 = sphi %s1206_s16, %s1427_s16   ;;  %s1130_s15 = sphi %s1204_s15, %s1426_s15  }
   0x9   : > { %s1229_s20 = sadd.s32 1, %s1142_s18   ;;  %s210_s21 = sadd.s32 1, %s1138_s17 }
   0xa   : > { %s207_s22 = ssub.s32 %s1142_s18, %s1229_s20  ;;  %p220_p0 = scmp.ne.s32.totalorder %s1138_s17, %s1134_s16 }
   0xb   : > { %p208_p1 = scmp.eq.s32.totalorder %s207_s22, 0  ;;  %p221_p2 = scmp.eq.s32.totalorder %s1225_s0, 1 }
   0xc   : > { %p226_p3 = scmp.ne.s32.totalorder %s1134_s16, %s1130_s15  ;;  %p227_p4 = scmp.eq.s32.totalorder %s983_s19, 1 }
   0xd   : > { %s1240_s23 = scalar_select %p208_p1, %s1138_s17, %s210_s21  }
   0xe   : > { %p1242_p5 = por %p221_p2, %p220_p0  ;;  %p1246_p6 = por %p227_p4, %p226_p3 }
   0xf   : > { %p986_p7 = scmp.ge.s32.totalorder %s1142_s18, 1  ;;  %p323_p8 = scmp.lt.s32.totalorder %s1142_s18, 3 }
  0x11   : > { %p324_p9 = pnand %p986_p7, %p323_p8 }
  0x12   : > { %p376_p10 = scmp.lt.s32.totalorder (!%p324_p9), %s1225_s0, 1  ;;  %v1144_v0 = vmov (!%p324_p9), 0   ;;  %vm497_vm0 = vcmask (!%p324_p9), 1041408   ;;  %v407_v1 = vld [vmem:[%s1409_s4] sm:$0xff] (!%p324_p9)  ;;  %s1422_s1 = sld [smem:[#allocation6_spill]] (!%p324_p9)  ;;  %v409_v2 = vld [vmem:[%s1409_s4 + $0x10] sm:$0xff] (!%p324_p9) }
  0x13   : > { %327 = sbr.rel (%p324_p9) target bundleno = 1646 (0x66e), region = 48  ;;  %536 = vmatprep.mubr.bf16.mxu0 (!%p324_p9), %v1144_v0  ;;  %1067 = vset.pattern.permute.xlu0 (!%p324_p9), %v1144_v0  ;;  %v408_v4 = vld [vmem:[%s1409_s4 + $0x8] sm:$0xff] (!%p324_p9)  ;;  %v410_v7 = vld [vmem:[%s1409_s4 + $0x18] sm:$0xff] (!%p324_p9)  ;;  %s1423_s3 = sld [smem:[#allocation8_spill]] (!%p324_p9)  ;;  %vm484_vm1 = vcmask (!%p324_p9), 31744   ;;  %v411_v9 = vld [vmem:[%s1409_s4 + $0x20] sm:$0xff] (!%p324_p9) }
  0x14   : > { %1068 = vset.pattern.permute.xlu1 (!%p324_p9), %v1144_v0  ;;  %644 = vmatprep.mubr.bf16.mxu1 (!%p324_p9), %v1144_v0  ;;  %v412_v10 = vld [vmem:[%s1409_s4 + $0x28] sm:$0xff] (!%p324_p9)  ;;  %v413_v11 = vld [vmem:[%s1409_s4 + $0x30] sm:$0xff] (!%p324_p9)  ;;  %v414_v12 = vld [vmem:[%s1409_s4 + $0x38] sm:$0xff] (!%p324_p9)  ;;  %vm608_vm2 = vcmask (!%p324_p9), 523264   ;;  %s359_s19 = sand.u32 (!%p324_p9), 1, %s1134_s16   ;;  %s1009_s22 = sshll.u32 (!%p324_p9), %s1225_s0, 2 }
  0x15   : > { %417 = vperm.xlu0 (!%p324_p9), %1067, %v407_v1   ;;  %427 = vperm.xlu1 (!%p324_p9), %1068, %v409_v2   ;;  %s1318_s21 = sshll.u32 (!%p324_p9), %s359_s19, 3  ;;  %vm695_vm3 = vcmask (!%p324_p9), 1043456   ;;  %s1424_s2 = sld [smem:[#allocation7_spill]] (!%p324_p9)  ;;  %vm691_vm4 = vcmask (!%p324_p9), 64512   ;;  %vm743_vm5 = vcmask (!%p324_p9), 1045504  }
  0x16   : > { %s361_s30 = scalar_lea.vmem (!%p324_p9), [#allocation3], %s1318_s21  ;;  %s397_s11 = sld [smem:[#allocation2]] (!%p324_p9) }
  0x17   : > { %s1145_s13 = smov (!%p324_p9), [#allocation3]  }
  0x18   : > { %s1084_s14 = sshll.u32 (!%p324_p9), %s1145_s13, 4  ;;  %s1085_s14 = int_to_ptr.vmem [resolvable:$false] %s1084_s14 }
  0x19   : > { %v1069_v8 = vld [vmem:[%s1423_s3] sm:$0xff] (!%p324_p9)   ;;  %422 = vperm.xlu0 (!%p324_p9), %1067, %v408_v4   ;;  %432 = vperm.xlu1 (!%p324_p9), %1068, %v410_v7   ;;  %v1070_v13 = vld [vmem:[%s1423_s3 + $0x8] sm:$0xff] (!%p324_p9)   ;;  %v1071_v14 = vld [vmem:[%s1423_s3 + $0x10] sm:$0xff] (!%p324_p9)  }
  0x1a   : > { %s1256_s26 = scalar_select %p376_p10, %s1225_s0, 1  ;;  %v1072_v15 = vld [vmem:[%s1423_s3 + $0x18] sm:$0xff]  }
  0x1b   : > { %s1086_s3 = scalar_lea.vmem %s1085_s14, 256 }
  0x1c   : > { %s1019_s27 = sshll.u32 %s1256_s26, 2  ;;  %s1020_s28 = sshll.u32 %s1256_s26, 4 }
  0x1d   : > { %s380_s12 = scalar_lea.vmem %s1422_s1, %s1019_s27  ;;  %437 = vperm.xlu0 %1067, %v411_v9   ;;  %442 = vperm.xlu1 %1068, %v412_v10   ;;  %s689_s27 = scalar_lea.vmem %s1424_s2, %s1009_s22 }
  0x1e   : > { %v1000_v3 = vld.sshfl [vmem:[%s380_s12] sm:$0x33 pattern:$0x76325410]  ;;  %s1416_s12 = sshll.u32 %s1256_s26, 3  ;;  %s814_s1 = scalar_lea.sflag [#allocation4], %s359_s19 }
  0x1f   : > { %v483_v5 = vcombine.high %v1000_v3, %v1000_v3  ;;  %v499_v6 = vsel %vm497_vm0, %v1000_v3, 0  ;;  %s390_s22 = scalar_lea.vmem %s1414_s9, %s1416_s12 }
  0x21   : > { %1001 = vmatprep.subr.msk.bf16.mxu0 %vm497_vm0, %v483_v5  ;;  %447 = vperm.xlu0 %1067, %v413_v11  }
  0x22   : > { %505 = vmatpush1.bf16.msra.mxu0 %v499_v6  ;;  %452 = vperm.xlu1 %1068, %v414_v12  }
  0x25   : > { %1002 = vmatmul.mubr.msk.bf16.vlgmr.msra.gmra.mrb[0].mxu0 %vm484_vm1, %v1069_v8 }
  0x26   : > { %546 = vmatprep.mubr.bf16.mxu0 %v1144_v0 }
  0x2d   : > { %1003 = vmatmul.mubr.msk.bf16.gmra.mrb[4].mxu0 %vm484_vm1, %v1070_v13 }
  0x2e   : > { %556 = vmatprep.mubr.bf16.mxu0 %v1144_v0 }
  0x35   : > { %1004 = vmatmul.mubr.msk.bf16.gmra.mrb[8].mxu0 %vm484_vm1, %v1071_v14 }
  0x36   : > { %566 = vmatprep.mubr.bf16.mxu0 %v1144_v0 }
  0x3d   : > { %1005 = vmatmul.mubr.msk.bf16.gmra.mrb[12].mxu0 %vm484_vm1, %v1072_v15 }
  0x94   : > { %v418_v16 = vpop.permute.xlu0 %417  ;;  %v428_v25 = vpop.permute.xlu1 %427 }
  0x98   : > { %v423_v18 = vpop.permute.xlu0 %422  ;;  %v433_v36 = vpop.permute.xlu1 %432 }
  0x9c   : > { %v438_v47 = vpop.permute.xlu0 %437  ;;  %v443_v52 = vpop.permute.xlu1 %442 }
  0xa0   : > { %v448_v63 = vpop.permute.xlu0 %447 }
  0xa1   : > { %v453_v5 = vpop.permute.xlu1 %452 }
  0xf8   : > { %v538_v17 = vpop.f32.mrb[0].mxu0 }
  0xf9   : > { %v539_v19 = vadd.f32 %v538_v17, %v418_v16  ;;  %v540_v20 = vpop.f32.mrb[1].mxu0  ;;  %v1073_v17 = vld [vmem:[%s1410_s5] sm:$0x7f]  }
  0xfa   : > { %v541_v21 = vadd.f32 %v540_v20, %v418_v16  ;;  %v542_v22 = vpop.f32.mrb[2].mxu0 }
  0xfb   : > { %v543_v23 = vadd.f32 %v542_v22, %v423_v18  ;;  %v544_v24 = vpop.f32.mrb[3].mxu0  ;;  %v577_v27 = vmax.f32 %v539_v19, 0.0 }
  0xfc   : > { %v545_v26 = vadd.f32 %v544_v24, %v423_v18  ;;  %v578_v29 = vmax.f32 %v541_v21, 0.0 }
  0xfd   : > { %v579_v28 = vmax.f32 %v543_v23, 0.0 }
  0xfe   : > { %v580_v30 = vmax.f32 %v545_v26, 0.0 }
  0xff   : > { %v593_v31 = vpack.c.bf16 %v579_v28, %v577_v27 }
 0x100   : > { %v548_v32 = vpop.f32.mrb[4].mxu0  ;;  %v594_v33 = vpack.c.bf16 %v580_v30, %v578_v29 }
 0x101   : > { %v549_v34 = vadd.f32 %v548_v32, %v428_v25  ;;  %v550_v35 = vpop.f32.mrb[5].mxu0 }
 0x102   : > { %v551_v37 = vadd.f32 %v550_v35, %v428_v25  ;;  %v552_v38 = vpop.f32.mrb[6].mxu0  ;;  %612 = vmatprep.subr.bf16.mxu1 %v594_v33 }
 0x103   : > { %v553_v39 = vadd.f32 %v552_v38, %v433_v36  ;;  %v554_v40 = vpop.f32.mrb[7].mxu0  ;;  %613 = vmatpush1.bf16.msra.mxu1 %v593_v31  ;;  %v581_v42 = vmax.f32 %v549_v34, 0.0 }
 0x104   : > { %v555_v41 = vadd.f32 %v554_v40, %v433_v36  ;;  %v582_v44 = vmax.f32 %v551_v37, 0.0  ;;  %v690_v36 = vld [vmem:[%s689_s27] sm:$0x7] }
 0x105   : > { %v583_v43 = vmax.f32 %v553_v39, 0.0 }
 0x106   : > { %v584_v45 = vmax.f32 %v555_v41, 0.0 }
 0x107   : > { %v595_v46 = vpack.c.bf16 %v583_v43, %v581_v42 }
 0x108   : > { %v596_v48 = vpack.c.bf16 %v584_v45, %v582_v44  ;;  %v558_v49 = vpop.f32.mrb[8].mxu0 }
 0x109   : > { %v559_v50 = vadd.f32 %v558_v49, %v438_v47  ;;  %v560_v51 = vpop.f32.mrb[9].mxu0 }
 0x10a   : > { %v561_v53 = vadd.f32 %v560_v51, %v438_v47  ;;  %v562_v54 = vpop.f32.mrb[10].mxu0  ;;  %614 = vmatprep.subr.bf16.mxu1 %v596_v48 }
 0x10b   : > { %v563_v55 = vadd.f32 %v562_v54, %v443_v52  ;;  %v564_v56 = vpop.f32.mrb[11].mxu0  ;;  %615 = vmatpush1.bf16.msra.mxu1 %v595_v46  ;;  %v585_v58 = vmax.f32 %v559_v50, 0.0 }
 0x10c   : > { %v565_v57 = vadd.f32 %v564_v56, %v443_v52  ;;  %v586_v60 = vmax.f32 %v561_v53, 0.0  ;;  %v769_v53 = vstv %s397_s11  ;;  %s1347_s11 = scalar_lea.vmem %s1412_s7, %s1020_s28  ;;  %s841_s28 = sshll.u32 %s361_s30, 4  ;;  %s842_s28 = int_to_ptr.vmem [resolvable:$true] %s841_s28 }
 0x10d   : > { %v587_v59 = vmax.f32 %v563_v55, 0.0  ;;  %s1080_s2 = scalar_lea.vmem %s842_s28, 128  ;;  %p1087_p0 = scmp.lt.s32.totalorder %s842_s28, %s1085_s14 }
 0x10e   : > { %v588_v61 = vmax.f32 %v565_v57, 0.0  ;;  %p1081_p11 = scmp.ne.s32.totalorder %s842_s28, %s1080_s2  ;;  %p1088_p1 = scmp.lt.s32.totalorder %s1086_s3, %s1080_s2 }
 0x10f   : > { %v597_v62 = vpack.c.bf16 %v587_v59, %v585_v58 }
 0x110   : > { %v598_v1 = vpack.c.bf16 %v588_v61, %v586_v60  ;;  %v568_v2 = vpop.f32.mrb[12].mxu0  ;;  %p1082_p12 = pnand %p1081_p11, %p1242_p5  ;;  %p1089_p2 = por %p1088_p1, %p1087_p0 }
 0x111   : > { %v569_v3 = vadd.f32 %v568_v2, %v448_v63  ;;  %v570_v4 = vpop.f32.mrb[13].mxu0 }
 0x112   : > { %v571_v6 = vadd.f32 %v570_v4, %v448_v63  ;;  %v572_v7 = vpop.f32.mrb[14].mxu0  ;;  %616 = vmatprep.subr.bf16.mxu1 %v598_v1  ;;  %p1083_p13 = pneg %p1082_p12 }
 0x113   : > { %v573_v8 = vadd.f32 %v572_v7, %v453_v5  ;;  %v574_v9 = vpop.f32.mrb[15].mxu0  ;;  %617 = vmatpush1.bf16.msra.mxu1 %v597_v62  ;;  %v589_v11 = vmax.f32 %v569_v3, 0.0 }
 0x114   : > { %v575_v10 = vadd.f32 %v574_v9, %v453_v5  ;;  %v590_v13 = vmax.f32 %v571_v6, 0.0  ;;  %p1090_p3 = pnand %p1089_p2, %p1083_p13 }
 0x115   : > { %v591_v12 = vmax.f32 %v573_v8, 0.0 }
 0x116   : > { %v592_v14 = vmax.f32 %v575_v10, 0.0 }
 0x117   : > { %v599_v15 = vpack.c.bf16 %v591_v12, %v589_v11 }
 0x118   : > { %v600_v16 = vpack.c.bf16 %v592_v14, %v590_v13 }
 0x11a   : > { %618 = vmatprep.subr.bf16.mxu1 %v600_v16  ;;  %v659_v16 = vld [vmem:[%s1411_s6] sm:$0xff] }
 0x11b   : > { %619 = vmatpush1.bf16.msra.mxu1 %v599_v15 }
 0x11e   : > { %1007 = vmatmul.mubr.msk.bf16.vlgmr.msra.gmra.mrb[0].mxu1 %vm608_vm2, %v1073_v17 }
 0x11f   : > { %734 = vmatprep.mubr.bf16.mxu1 %v1144_v0 }
 0x1f1   : > { %v646_v18 = vpop.f32.mrb[0].mxu1 }
 0x1f2   : > { %v648_v19 = vpop.f32.mrb[1].mxu1 }
 0x1f3   : > { %v1311_v20 = vpop.f32.mrb[2].mxu1  ;;  %v667_v21 = vmin.f32 %v646_v18, %v648_v19  ;;  %v655_v22 = vadd.f32 %v648_v19, %v646_v18 }
 0x1f4   : > { %v1313_v23 = vpop.f32.mrb[3].mxu1 }
 0x1f5   : > { %668 = vmin.xlane.f32.xlu0 %v667_v21 }
 0x282   : > { %v669_v24 = vpop.xlane.xlu0 %668 }
 0x283   : > { %v670_v25 = vsub.f32 %v646_v18, %v669_v24  ;;  %v671_v26 = vsub.f32 %v648_v19, %v669_v24 }
 0x285   : > { %v672_v27 = vmax.f32 %v670_v25, %v671_v26 }
 0x287   : > { %673 = vmax.xlane.f32.xlu1 %v672_v27 }
 0x314   : > { %v674_v28 = vpop.xlane.xlu1 %673 }
 0x315   : > { %v675_v29 = vadd.f32 1e-12, %v674_v28 }
 0x317   : > { %1074 = vrcp.f32 %v675_v29 }
 0x321   : > { %v1075_v0 = vpop.eup %1074 }
 0x322   : > { %v678_v30 = vmul.f32 %v1075_v0, %v671_v26  ;;  %v677_v31 = vmul.f32 %v1075_v0, %v670_v25 }
 0x324   : > { %v680_v32 = vpack.c.bf16 %v678_v30, %v678_v30  ;;  %v679_v33 = vpack.c.bf16 %v677_v31, %v677_v31  ;;  %v1023_v34 = vpack.c.bf16 %v678_v30, %v677_v31 }
 0x326   : > { %1010 = vmatprep.subr.msk.bf16.mxu1 %vm695_vm3, %v680_v32  ;;  %v697_v35 = vsel %vm695_vm3, %v679_v33, 0  ;;  %687 = vst [vmem:[%s361_s30] sm:$0xff] %v1023_v34 }
 0x327   : > { %703 = vmatpush1.bf16.msra.mxu1 %v697_v35 }
 0x32a   : > { %1011 = vmatmul.mubr.msk.bf16.vlgmr.msra.gmra.mrb[4].mxu1 %vm691_vm4, %v690_v36 }
 0x3fd   : > { %v736_v37 = vpop.f32.mrb[4].mxu1 }
 0x3fe   : > { %v744_v38 = vsel %vm743_vm5, %v736_v37, inf  ;;  %v738_v39 = vpop.f32.mrb[5].mxu1 }
 0x3ff   : > { %v745_v40 = vsel %vm743_vm5, %v738_v39, inf  ;;  %v740_v41 = vpop.f32.mrb[6].mxu1 }
 0x400   : > { %v746_v42 = vmin.f32 %v744_v38, %v745_v40  ;;  %v741_v43 = vpop.f32.mrb[7].mxu1 }
 0x402   : > { %747 = vmin.xlane.f32.xlu0 %v746_v42 }
 0x48f   : > { %v748_v44 = vpop.xlane.xlu0 %747 }
 0x490   : > { %v749_v45 = vsub.f32 %v736_v37, %v748_v44  ;;  %v750_v46 = vsub.f32 %v738_v39, %v748_v44 }
 0x492   : > { %v751_v47 = vsel %vm743_vm5, %v749_v45, -inf  ;;  %v752_v48 = vsel %vm743_vm5, %v750_v46, -inf }
 0x493   : > { %v753_v49 = vmax.f32 %v751_v47, %v752_v48 }
 0x495   : > { %754 = vmax.xlane.f32.xlu0 %v753_v49 }
 0x499   : > { %656 = vadd.xlane.f32.xlu0 %v655_v22 }
 0x522   : > { %v755_v50 = vpop.xlane.xlu0 %754 }
 0x523   : > { %v756_v51 = vadd.f32 1e-12, %v755_v50 }
 0x525   : > { %1076 = vrcp.f32 %v756_v51 }
 0x526   : > { %v657_v6 = vpop.xlane.xlu0 %656 }
 0x527   : > { %v658_v15 = vmul.f32 0.00390625, %v657_v6 }
 0x529   : > { %v660_v17 = vadd.f32 %v659_v16, %v658_v15 }
 0x52f   : > { %v1077_v52 = vpop.eup %1076 }
 0x530   : > { %v758_v54 = vmul.f32 %v1077_v52, %v749_v45  ;;  %v759_v55 = vmul.f32 %v1077_v52, %v750_v46 }
 0x532   : > { %v770_v56 = vmul.f32 %v769_v53, %v758_v54  ;;  %v771_v57 = vmul.f32 %v769_v53, %v759_v55  ;;  %v1024_v58 = vpack.c.bf16 %v759_v55, %v758_v54 }
 0x534   : > { %v772_v59 = vadd.f32 1.0, %v770_v56  ;;  %v773_v60 = vadd.f32 1.0, %v771_v57  ;;  %768 = vst [vmem:[%s390_s22] sm:$0x77] %v1024_v58  ;;  %s1026_s22 = sshll.u32 %s1225_s0, 7 }
 0x535   : > { %s1361_s12 = scalar_lea.hbm %s1413_s8, %s1026_s22 }
 0x536   : > { %v774_v61 = vmul.f32 %v772_v59, %v1311_v20  ;;  %v775_v62 = vmul.f32 %v773_v60, %v1313_v23 }
 0x538   : > { %v801_v63 = vsel %vm743_vm5, %v774_v61, 0.0  ;;  %v802_v1 = vsel %vm743_vm5, %v775_v62, 0.0  ;;  %v776_v2 = vsel %vm743_vm5, %v774_v61, inf  ;;  %v777_v3 = vsel %vm743_vm5, %v775_v62, inf }
 0x539   : > { %v803_v4 = vadd.f32 %v802_v1, %v801_v63  ;;  %v778_v5 = vmin.f32 %v776_v2, %v777_v3 }
 0x53b   : > { %804 = vadd.xlane.f32.xlu0 %v803_v4  ;;  %779 = vmin.xlane.f32.xlu1 %v778_v5 }
 0x5c8   : > { %v780_v7 = vpop.xlane.xlu1 %779  ;;  %v805_v8 = vpop.xlane.xlu0 %804 }
 0x5c9   : > { %v781_v9 = vsub.f32 %v774_v61, %v780_v7  ;;  %v782_v10 = vsub.f32 %v775_v62, %v780_v7  ;;  %v806_v11 = vmul.f32 0.00390625, %v805_v8 }
 0x5cb   : > { %v783_v12 = vsel %vm743_vm5, %v781_v9, -inf  ;;  %v784_v13 = vsel %vm743_vm5, %v782_v10, -inf  ;;  %807 = vst [vmem:[%s1347_s11 + $0x8] sm:$0x3f] %v806_v11 }
 0x5cc   : > { %v785_v14 = vmax.f32 %v783_v12, %v784_v13 }
 0x5ce   : > { %786 = vmax.xlane.f32.xlu1 %v785_v14 }
 0x5df   : > { %663 = vperm.xlu1 %1068, %v660_v17  }
 0x5e0   : > { %1093 = shalt.err (!%p1090_p3)
}
 0x5e1   : > { %s1094_s0 = scalar_lea.hbm %s1361_s12, 128  ;;  %s1098_s30 = scalar_lea.hbm %s1413_s8, 256 }
 0x5e2   : > { %p1095_p4 = scmp.ne.s32.totalorder %s1361_s12, %s1094_s0  ;;  %p1099_p9 = scmp.lt.u32.totalorder %s1361_s12, %s1413_s8 }
 0x5e3   : > { %p1100_p10 = scmp.lt.u32.totalorder %s1098_s30, %s1094_s0  ;;  %p1102_p12 = scmp.lt.u32.totalorder %s1094_s0, %s1361_s12 }
 0x5e4   : > { %p1096_p7 = pnand %p1095_p4, %p1242_p5 }
 0x5e5   : > { %p1101_p11 = por %p1100_p10, %p1099_p9 }
 0x5e6   : > { %p1097_p8 = pneg %p1096_p7 }
 0x5e7   : > { %p1103_p13 = por %p1102_p12, %p1101_p11 }
 0x5e9   : > { %p1104_p0 = pnand %p1103_p13, %p1097_p8 }
 0x5eb   : > { %1107 = shalt.err (!%p1104_p0)
}
 0x5ec   : > { %1027 = dma.vmem_to_hbm [thread:$0]  (%p1242_p5), %s842_s28, 128, %s1361_s12, %s814_s1  }
 0x5ed   : > { %s1425_s2 = sshll.u32 %s1256_s26, 3 }
 0x5ee   : > { %s395_s13 = scalar_lea.vmem %s1415_s10, %s1425_s2 }
 0x65b   : > { %v787_v18 = vpop.xlane.xlu1 %786 }
 0x65c   : > { %v788_v19 = vadd.f32 1e-12, %v787_v18 }
 0x65e   : > { %1078 = vrcp.f32 %v788_v19 }
 0x65f   : > { %v664_v20 = vpop.permute.xlu1 %663 }
 0x660   : > { %666 = vst [vmem:[%s1347_s11] sm:$0xff] %v664_v20 }
 0x668   : > { %v1079_v21 = vpop.eup %1078 }
 0x669   : > { %v790_v22 = vmul.f32 %v1079_v21, %v781_v9  ;;  %v791_v23 = vmul.f32 %v1079_v21, %v782_v10 }
 0x66b   : > { %v1025_v24 = vpack.c.bf16 %v791_v23, %v790_v22 }
 0x66d   : > { %800 = vst [vmem:[%s395_s13] sm:$0x77] %v1025_v24 }
 0x66e PF: > { %p1033_p5 = scmp.ge.s32.totalorder %s1142_s18, 2  ;;  %s867_s1 = sand.u32 1, %s1130_s15  }
 0x66f   : > { %s868_s24 = scalar_lea.sflag [#allocation4], %s867_s1 }
 0x670   : > { %p1030_p1 = pnand %p1033_p5, %p1246_p6 }
 0x672   : > { %1125 = dma.done.wait (!%p1030_p1), %s868_s24, 128  }
 0x673   : > { %1127 = vsyncadd (!%p1030_p1), %s868_s24, 4294967168  ;;  %p22_p2 = scmp.ge.s32.totalorder %s1229_s20, 4   ;;  %s1426_s15 = smov %s1134_s16 }
 0x674   : > { %s1427_s16 = smov %s1138_s17  ;;  %s1428_s17 = smov %s1240_s23 }
 0x675   : > { %s1429_s18 = smov %s1229_s20  ;;  %24 = sbr.rel (!%p22_p2) target bundleno = 8 (0x8), region = 120 }
 0x67c   :  { %889 = vsyncpa [#allocation4], 1 }
 0x67d   :  { %891 = vsyncpa [#allocation4 + $0x1], 1 }

</bundles_post_ra>
